<compile_context>
chip_gen: v5e
topology: v5e:2x2
jax: 0.10.0
libtpu: 0.0.40
codegen_flags: <defaults>
</compile_context>

<pallas_src>
import jax
import jax.numpy as jnp
from jax.experimental import pallas as pl
from jax.experimental.pallas import tpu as pltpu


# ----------------------------------------------------------------------------
# Pallas kernel: one batch tile of the fused MLP
# ----------------------------------------------------------------------------
def mlp_kernel(x_ref,
               w1_ref, b1_ref,
               w2_ref, b2_ref,
               w3_ref, b3_ref,
               w4_ref, b4_ref,
               o_ref):
    x = x_ref[...]                                                      # (TB, 1024) bf16

    h1 = jnp.dot(x, w1_ref[...], preferred_element_type=jnp.float32)   # (TB, 256) f32
    h1 = jnp.maximum(h1 + b1_ref[...], 0.0).astype(jnp.bfloat16)

    h2 = jnp.dot(h1, w2_ref[...], preferred_element_type=jnp.float32)  # (TB, 128) f32
    h2 = jnp.maximum(h2 + b2_ref[...], 0.0).astype(jnp.bfloat16)

    h3 = jnp.dot(h2, w3_ref[...], preferred_element_type=jnp.float32)  # (TB, 128) f32 (lane-padded)
    h3 = jnp.maximum(h3 + b3_ref[...], 0.0).astype(jnp.bfloat16)

    out = jnp.dot(h3, w4_ref[...], preferred_element_type=jnp.float32) # (TB, 128) f32
    o_ref[...] = (out + b4_ref[...]).astype(o_ref.dtype)               # bf16 lane-dense store


def _round_up(x, m):
    return ((x + m - 1) // m) * m


def _cdiv(a, b):
    return -(-a // b)


# ----------------------------------------------------------------------------
# Wrapper: flatten like x.view(-1, 32*32), tile the batch, pad fc3/fc4 lanes.
# ----------------------------------------------------------------------------
def mlp_forward(x, params, *, tb=None, max_tb=2048):
    # Cast to bf16 BEFORE padding (halves the bytes the pre-kernel copy moves).
    x_bf = x.reshape(-1, 32 * 32).astype(jnp.bfloat16)
    B = x_bf.shape[0]

    if tb is None:
        # Smallest number of tiles such that each tile fits under max_tb.
        n_tiles = max(_cdiv(B, max_tb), 1)
        # v7x megacore: guarantee >= 2 grid steps when the batch allows a
        # 16-row (bf16-native) tile per step; single-TC chips are unaffected.
        if n_tiles < 2 and B >= 32:
            n_tiles = 2
        tb = _round_up(_cdiv(B, n_tiles), 16)
    else:
        tb = _round_up(tb, 16)

    B_pad = _round_up(B, tb)
    if B_pad != B:
        x_bf = jnp.pad(x_bf, ((0, B_pad - B), (0, 0)))

    (w1, b1), (w2, b2), (w3, b3), (w4, b4) = params

    # bf16 weights for the MXU; biases stay f32 (epilogue math is f32).
    w1b = w1.astype(jnp.bfloat16)                                    # (1024, 256)
    w2b = w2.astype(jnp.bfloat16)                                    # (256, 128)
    # Pad fc3 output / fc4 input from 64 to 128 lanes, and fc4 output to 128,
    # so h3 and the final store are full-lane and fc4 contracts over K=128.
    w3p = jnp.zeros((128, 128), jnp.float32).at[:, :64].set(w3).astype(jnp.bfloat16)
    b3p = jnp.zeros((1, 128), jnp.float32).at[:, :64].set(b3)
    w4p = jnp.zeros((128, 128), jnp.float32).at[:64, :10].set(w4).astype(jnp.bfloat16)
    b4p = jnp.zeros((1, 128), jnp.float32).at[:, :10].set(b4)

    grid = (B_pad // tb,)

    def const_spec(shape):
        # Weights/biases: constant index_map -> resident in VMEM across steps.
        return pl.BlockSpec(shape, lambda i: (0, 0))

    out = pl.pallas_call(
        mlp_kernel,
        out_shape=jax.ShapeDtypeStruct((B_pad, 128), jnp.bfloat16),
        grid=grid,
        in_specs=[
            pl.BlockSpec((tb, 1024), lambda i: (i, 0)),   # x: tiled over batch
            const_spec(w1b.shape), const_spec(b1.shape),
            const_spec(w2b.shape), const_spec(b2.shape),
            const_spec(w3p.shape), const_spec(b3p.shape),
            const_spec(w4p.shape), const_spec(b4p.shape),
        ],
        out_specs=pl.BlockSpec((tb, 128), lambda i: (i, 0)),
        compiler_params=pltpu.CompilerParams(
            dimension_semantics=("parallel",),
            vmem_limit_bytes=32 * 1024 * 1024,   # v5e default is only 16 MiB
        ),
    )(x_bf, w1b, b1, w2b, b2, w3p, b3p, w4p, b4p)

    # Drop batch padding and the 118 zero logit lanes; hand back f32 logits.
    return out[:B, :10].astype(jnp.float32)


# ----------------------------------------------------------------------------
# Deterministic parameter init (PyTorch nn.Linear default: U(-1/sqrt(fan_in), +))
# Weights stored as (in_features, out_features); biases as (1, out_features).
# ----------------------------------------------------------------------------
def init_params(key):
    dims = [(32 * 32, 256), (256, 128), (128, 64), (64, 10)]
    params = []
    for (fan_in, fan_out) in dims:
        key, kw, kb = jax.random.split(key, 3)
        bound = 1.0 / jnp.sqrt(jnp.float32(fan_in))
        w = jax.random.uniform(kw, (fan_in, fan_out), jnp.float32, -bound, bound)
        b = jax.random.uniform(kb, (1, fan_out), jnp.float32, -bound, bound)
        params.append((w, b))
    return params


if __name__ == "__main__":
    key = jax.random.PRNGKey(0)
    key, kx = jax.random.split(key)

    # Small NCHW-like input consistent with x.view(-1, 32*32): (B, 1, 32, 32)
    x = jax.random.normal(kx, (8, 1, 32, 32), dtype=jnp.float32)

    params = init_params(key)

    y = mlp_forward(x, params)
    jax.block_until_ready(y)

    # Reference check in plain JAX (f32 math, same params). bf16 matmul inputs
    # and the bf16 writeback loosen agreement, so use a relaxed tolerance.
    def ref(xin):
        h = xin.reshape(-1, 32 * 32)
        for i, (w, b) in enumerate(params):
            h = h @ w + b
            if i < 3:
                h = jnp.maximum(h, 0.0)
        return h

    y_ref = ref(x)
    assert y.shape == (8, 10)
    assert jnp.allclose(y, y_ref, atol=5e-2, rtol=5e-2), (
        float(jnp.max(jnp.abs(y - y_ref))))

    print("KERNEL_OK")
</pallas_src>

<mosaic_0001>
module attributes {stable_mosaic.version = 11 : i64} {
  func.func @mlp_kernel(%arg0: i32, %arg1: memref<16x1024xbf16, #tpu.memory_space<vmem>>, %arg2: memref<1024x256xbf16, #tpu.memory_space<vmem>>, %arg3: memref<1x256xf32, #tpu.memory_space<vmem>>, %arg4: memref<256x128xbf16, #tpu.memory_space<vmem>>, %arg5: memref<1x128xf32, #tpu.memory_space<vmem>>, %arg6: memref<128x128xbf16, #tpu.memory_space<vmem>>, %arg7: memref<1x128xf32, #tpu.memory_space<vmem>>, %arg8: memref<128x128xbf16, #tpu.memory_space<vmem>>, %arg9: memref<1x128xf32, #tpu.memory_space<vmem>>, %arg10: memref<16x128xbf16, #tpu.memory_space<vmem>>) attributes {dimension_semantics = [#tpu.dimension_semantics<parallel>], iteration_bounds = array<i64: 1>, scalar_prefetch = 0 : i64, scratch_operands = 0 : i64, tpu.core_type = #tpu.core_type<tc>, window_params = [{transform_indices = @transform_0, window_bounds = array<i64: 16, 1024>}, {pipeline_mode = #tpu.pipeline_mode<synchronous>, transform_indices = @transform_1, window_bounds = array<i64: 1024, 256>}, {pipeline_mode = #tpu.pipeline_mode<synchronous>, transform_indices = @transform_2, window_bounds = array<i64: 1, 256>}, {pipeline_mode = #tpu.pipeline_mode<synchronous>, transform_indices = @transform_3, window_bounds = array<i64: 256, 128>}, {pipeline_mode = #tpu.pipeline_mode<synchronous>, transform_indices = @transform_4, window_bounds = array<i64: 1, 128>}, {pipeline_mode = #tpu.pipeline_mode<synchronous>, transform_indices = @transform_5, window_bounds = array<i64: 128, 128>}, {pipeline_mode = #tpu.pipeline_mode<synchronous>, transform_indices = @transform_6, window_bounds = array<i64: 1, 128>}, {pipeline_mode = #tpu.pipeline_mode<synchronous>, transform_indices = @transform_7, window_bounds = array<i64: 128, 128>}, {pipeline_mode = #tpu.pipeline_mode<synchronous>, transform_indices = @transform_8, window_bounds = array<i64: 1, 128>}, {transform_indices = @transform_9, window_bounds = array<i64: 16, 128>}]} {
    %c0 = arith.constant 0 : index
    %c0_0 = arith.constant 0 : index
    %0 = vector.load %arg1[%c0, %c0_0] : memref<16x1024xbf16, #tpu.memory_space<vmem>>, vector<16x1024xbf16>
    %c0_1 = arith.constant 0 : index
    %c0_2 = arith.constant 0 : index
    %1 = vector.load %arg2[%c0_1, %c0_2] : memref<1024x256xbf16, #tpu.memory_space<vmem>>, vector<1024x256xbf16>
    %cst = arith.constant dense<0.000000e+00> : vector<16x256xf32>
    %2 = tpu.matmul %0, %1, %cst {dimension_numbers = #tpu.dot_dimension_numbers<[1], [0], [0], [1], [0, 0, 1, 1], [], []>} : vector<16x1024xbf16>, vector<1024x256xbf16>, vector<16x256xf32> -> vector<16x256xf32>
    %c0_3 = arith.constant 0 : index
    %c0_4 = arith.constant 0 : index
    %3 = vector.load %arg3[%c0_3, %c0_4] : memref<1x256xf32, #tpu.memory_space<vmem>>, vector<1x256xf32>
    %4 = vector.broadcast %3 : vector<1x256xf32> to vector<16x256xf32>
    %5 = arith.addf %2, %4 : vector<16x256xf32>
    %cst_5 = arith.constant 0.000000e+00 : f32
    %6 = vector.broadcast %cst_5 : f32 to vector<16x256xf32>
    %7 = arith.maximumf %5, %6 : vector<16x256xf32>
    %8 = arith.truncf %7 : vector<16x256xf32> to vector<16x256xbf16>
    %c0_6 = arith.constant 0 : index
    %c0_7 = arith.constant 0 : index
    %9 = vector.load %arg4[%c0_6, %c0_7] : memref<256x128xbf16, #tpu.memory_space<vmem>>, vector<256x128xbf16>
    %cst_8 = arith.constant dense<0.000000e+00> : vector<16x128xf32>
    %10 = tpu.matmul %8, %9, %cst_8 {dimension_numbers = #tpu.dot_dimension_numbers<[1], [0], [0], [1], [0, 0, 1, 1], [], []>} : vector<16x256xbf16>, vector<256x128xbf16>, vector<16x128xf32> -> vector<16x128xf32>
    %c0_9 = arith.constant 0 : index
    %c0_10 = arith.constant 0 : index
    %11 = vector.load %arg5[%c0_9, %c0_10] : memref<1x128xf32, #tpu.memory_space<vmem>>, vector<1x128xf32>
    %12 = vector.broadcast %11 : vector<1x128xf32> to vector<16x128xf32>
    %13 = arith.addf %10, %12 : vector<16x128xf32>
    %cst_11 = arith.constant 0.000000e+00 : f32
    %14 = vector.broadcast %cst_11 : f32 to vector<16x128xf32>
    %15 = arith.maximumf %13, %14 : vector<16x128xf32>
    %16 = arith.truncf %15 : vector<16x128xf32> to vector<16x128xbf16>
    %c0_12 = arith.constant 0 : index
    %c0_13 = arith.constant 0 : index
    %17 = vector.load %arg6[%c0_12, %c0_13] : memref<128x128xbf16, #tpu.memory_space<vmem>>, vector<128x128xbf16>
    %cst_14 = arith.constant dense<0.000000e+00> : vector<16x128xf32>
    %18 = tpu.matmul %16, %17, %cst_14 {dimension_numbers = #tpu.dot_dimension_numbers<[1], [0], [0], [1], [0, 0, 1, 1], [], []>} : vector<16x128xbf16>, vector<128x128xbf16>, vector<16x128xf32> -> vector<16x128xf32>
    %c0_15 = arith.constant 0 : index
    %c0_16 = arith.constant 0 : index
    %19 = vector.load %arg7[%c0_15, %c0_16] : memref<1x128xf32, #tpu.memory_space<vmem>>, vector<1x128xf32>
    %20 = vector.broadcast %19 : vector<1x128xf32> to vector<16x128xf32>
    %21 = arith.addf %18, %20 : vector<16x128xf32>
    %cst_17 = arith.constant 0.000000e+00 : f32
    %22 = vector.broadcast %cst_17 : f32 to vector<16x128xf32>
    %23 = arith.maximumf %21, %22 : vector<16x128xf32>
    %24 = arith.truncf %23 : vector<16x128xf32> to vector<16x128xbf16>
    %c0_18 = arith.constant 0 : index
    %c0_19 = arith.constant 0 : index
    %25 = vector.load %arg8[%c0_18, %c0_19] : memref<128x128xbf16, #tpu.memory_space<vmem>>, vector<128x128xbf16>
    %cst_20 = arith.constant dense<0.000000e+00> : vector<16x128xf32>
    %26 = tpu.matmul %24, %25, %cst_20 {dimension_numbers = #tpu.dot_dimension_numbers<[1], [0], [0], [1], [0, 0, 1, 1], [], []>} : vector<16x128xbf16>, vector<128x128xbf16>, vector<16x128xf32> -> vector<16x128xf32>
    %c0_21 = arith.constant 0 : index
    %c0_22 = arith.constant 0 : index
    %27 = vector.load %arg9[%c0_21, %c0_22] : memref<1x128xf32, #tpu.memory_space<vmem>>, vector<1x128xf32>
    %28 = vector.broadcast %27 : vector<1x128xf32> to vector<16x128xf32>
    %29 = arith.addf %26, %28 : vector<16x128xf32>
    %30 = arith.truncf %29 : vector<16x128xf32> to vector<16x128xbf16>
    %c0_23 = arith.constant 0 : index
    %c0_24 = arith.constant 0 : index
    %31 = vector.load %arg10[%c0_23, %c0_24] : memref<16x128xbf16, #tpu.memory_space<vmem>>, vector<16x128xbf16>
    tpu.vector_store %arg10[%c0_23, %c0_24], %30 {strides = array<i32>} : memref<16x128xbf16, #tpu.memory_space<vmem>>, vector<16x128xbf16>,
    return
  }
  func.func @transform_0(%arg0: i32) -> (i32, i32) {
    %c0_i32 = arith.constant 0 : i32
    %c0_i32_0 = arith.constant 0 : i32
    return %arg0, %c0_i32 : i32, i32
  }
  func.func @transform_1(%arg0: i32) -> (i32, i32) {
    %c0_i32 = arith.constant 0 : i32
    %c0_i32_0 = arith.constant 0 : i32
    %c0_i32_1 = arith.constant 0 : i32
    return %c0_i32, %c0_i32_0 : i32, i32
  }
  func.func @transform_2(%arg0: i32) -> (i32, i32) {
    %c0_i32 = arith.constant 0 : i32
    %c0_i32_0 = arith.constant 0 : i32
    %c0_i32_1 = arith.constant 0 : i32
    return %c0_i32, %c0_i32_0 : i32, i32
  }
  func.func @transform_3(%arg0: i32) -> (i32, i32) {
    %c0_i32 = arith.constant 0 : i32
    %c0_i32_0 = arith.constant 0 : i32
    %c0_i32_1 = arith.constant 0 : i32
    return %c0_i32, %c0_i32_0 : i32, i32
  }
  func.func @transform_4(%arg0: i32) -> (i32, i32) {
    %c0_i32 = arith.constant 0 : i32
    %c0_i32_0 = arith.constant 0 : i32
    %c0_i32_1 = arith.constant 0 : i32
    return %c0_i32, %c0_i32_0 : i32, i32
  }
  func.func @transform_5(%arg0: i32) -> (i32, i32) {
    %c0_i32 = arith.constant 0 : i32
    %c0_i32_0 = arith.constant 0 : i32
    %c0_i32_1 = arith.constant 0 : i32
    return %c0_i32, %c0_i32_0 : i32, i32
  }
  func.func @transform_6(%arg0: i32) -> (i32, i32) {
    %c0_i32 = arith.constant 0 : i32
    %c0_i32_0 = arith.constant 0 : i32
    %c0_i32_1 = arith.constant 0 : i32
    return %c0_i32, %c0_i32_0 : i32, i32
  }
  func.func @transform_7(%arg0: i32) -> (i32, i32) {
    %c0_i32 = arith.constant 0 : i32
    %c0_i32_0 = arith.constant 0 : i32
    %c0_i32_1 = arith.constant 0 : i32
    return %c0_i32, %c0_i32_0 : i32, i32
  }
  func.func @transform_8(%arg0: i32) -> (i32, i32) {
    %c0_i32 = arith.constant 0 : i32
    %c0_i32_0 = arith.constant 0 : i32
    %c0_i32_1 = arith.constant 0 : i32
    return %c0_i32, %c0_i32_0 : i32, i32
  }
  func.func @transform_9(%arg0: i32) -> (i32, i32) {
    %c0_i32 = arith.constant 0 : i32
    %c0_i32_0 = arith.constant 0 : i32
    return %arg0, %c0_i32 : i32, i32
  }
}

</mosaic_0001>

<bundles_post_ra>
// kernel: tpu_custom_call.1
= control target key start
LH: loop header
LB: loop body
LE: loop exit
PB: predicated region body
PF: predicated region fallthrough
CT: control target
= control target key end

     0   :  { %14 = vsyncpa [#allocation3], 0  ;;  %s2713_s0 = inlined_call_operand.hbm [shape: bf16[16,1024], index: 0, kind: input, shape index: {}]   ;;  %s2714_s1 = inlined_call_operand.hbm [shape: bf16[1024,256], index: 1, kind: input, shape index: {}]   ;;  %s2715_s2 = inlined_call_operand.hbm [shape: f32[1,256], index: 2, kind: input, shape index: {}]   ;;  %s2716_s3 = inlined_call_operand.hbm [shape: bf16[256,128], index: 3, kind: input, shape index: {}]   ;;  %s2717_s4 = inlined_call_operand.vmem [shape: f32[1,128], index: 4, kind: input, shape index: {}]   ;;  %s2718_s5 = inlined_call_operand.hbm [shape: bf16[128,128], index: 5, kind: input, shape index: {}]   ;;  %s2719_s6 = inlined_call_operand.vmem [shape: f32[1,128], index: 6, kind: input, shape index: {}]   ;;  %s2720_s7 = inlined_call_operand.hbm [shape: bf16[128,128], index: 7, kind: input, shape index: {}]   ;;  %s2721_s8 = inlined_call_operand.vmem [shape: f32[1,128], index: 8, kind: input, shape index: {}]   ;;  %s2722_s9 = inlined_call_operand.hbm [shape: bf16[16,128], index: 9, kind: output, shape index: {}]  }
   0x1   :  { %15 = vsyncpa [#allocation6], 0 }
   0x2   :  { %16 = vsyncpa [#allocation9], 0 }
   0x3   :  { %17 = vsyncpa [#allocation12], 0  ;;  %s36_s11 = sshll.u32 %s2714_s1, 4  ;;  %s37_s11 = int_to_ptr.hbm [resolvable:$true] %s36_s11 }
   0x4   :  { %18 = vsyncpa [#allocation4], 0  ;;  %s2572_s12 = smov [#allocation5]   ;;  %s60_s16 = sshll.u32 %s2716_s3, 4  ;;  %s61_s16 = int_to_ptr.hbm [resolvable:$true] %s60_s16 }
   0x5   :  { %s38_s13 = sshll.u32 %s2572_s12, 4  ;;  %s2573_s17 = smov 128   ;;  %s39_s13 = int_to_ptr.vmem [resolvable:$true] %s38_s13 }
   0x6   :  { %s2574_s18 = smov 8   ;;  %s2575_s19 = smov [#allocation8]  }
   0x7   :  { %44 = dma.hbm_to_vmem [thread:$0]  %s37_s11, 16384, %s39_s13, [#allocation6], %s2573_s17, %s2573_s17, %s2574_s18  }
   0x8   :  { %s62_s20 = sshll.u32 %s2575_s19, 4  ;;  %s2576_s21 = smov 64   ;;  %s63_s20 = int_to_ptr.vmem [resolvable:$true] %s62_s20 }
   0x9   :  { %s2577_s22 = smov 4   ;;  %s23_s24 = sshll.u32 %s2713_s0, 4  ;;  %s24_s24 = int_to_ptr.hbm [resolvable:$true] %s23_s24 }
   0xa   :  { %68 = dma.hbm_to_vmem [thread:$0]  %s61_s16, 2048, %s63_s20, [#allocation9], %s2576_s21, %s2576_s21, %s2577_s22  }
   0xb   :  { %s2578_s25 = smov [#allocation2]   ;;  %s50_s28 = sshll.u32 %s2715_s2, 4  ;;  %s51_s28 = int_to_ptr.hbm [resolvable:$true] %s50_s28 }
   0xc   :  { %s25_s3 = sshll.u32 %s2578_s25, 4  ;;  %s2579_s29 = smov 512   ;;  %s26_s3 = int_to_ptr.vmem [resolvable:$true] %s25_s3 }
   0xd   :  { %s2580_s30 = smov 32   ;;  %s2581_s10 = smov [#allocation7]  }
   0xe   :  { %31 = dma.hbm_to_vmem [thread:$0]  %s24_s24, 1024, %s26_s3, [#allocation3], %s2579_s29, %s2579_s29, %s2580_s30  }
   0xf   :  { %s52_s11 = sshll.u32 %s2581_s10, 4  ;;  %s75_s14 = sshll.u32 %s2718_s5, 4  ;;  %s53_s11 = int_to_ptr.vmem [resolvable:$true] %s52_s11  ;;  %s76_s14 = int_to_ptr.hbm [resolvable:$true] %s75_s14 }
  0x10   :  { %55 = dma.hbm_to_vmem [thread:$0]  %s51_s28, 32, %s53_s11, [#allocation6]  }
  0x11   :  { %s90_s16 = sshll.u32 %s2720_s7, 4  ;;  %s2582_s17 = smov [#allocation10]   ;;  %s91_s16 = int_to_ptr.hbm [resolvable:$true] %s90_s16 }
  0x12   :  { %s77_s18 = sshll.u32 %s2582_s17, 4  ;;  %s2583_s2 = smov [#allocation11]   ;;  %s78_s18 = int_to_ptr.vmem [resolvable:$true] %s77_s18 }
  0x13   :  { %83 = dma.hbm_to_vmem [thread:$0]  %s76_s14, 1024, %s78_s18, [#allocation9], %s2576_s21, %s2576_s21, %s2577_s22  }
  0x14   :  { %s92_s19 = sshll.u32 %s2583_s2, 4  ;;  %s93_s19 = int_to_ptr.vmem [resolvable:$true] %s92_s19 }
  0x15   :  { %98 = dma.hbm_to_vmem [thread:$0]  %s91_s16, 1024, %s93_s19, [#allocation12], %s2576_s21, %s2576_s21, %s2577_s22  }
  0x16   :  { %2562 = dma.done.wait [#allocation3], 1024  }
  0x17   :  { %2563 = vsyncadd [#allocation3], 4294966272 }
  0x18   :  { %2564 = dma.done.wait [#allocation6], 16416  }
  0x19   :  { %2565 = vsyncadd [#allocation6], 4294950880 }
  0x1a   :  { %2566 = dma.done.wait [#allocation9], 3072  }
  0x1b   :  { %2567 = vsyncadd [#allocation9], 4294964224 }
  0x1c   :  { %2568 = dma.done.wait [#allocation12], 1024  }
  0x1d   :  { %2569 = vsyncadd [#allocation12], 4294966272  ;;  %v1623_v0 = vld [vmem:[#allocation5 + $0x70] sm:$0xf]  ;;  %v2228_v1 = vld [vmem:[#allocation5 + $0x74] sm:$0xf0] }
  0x1e   :  { %v1687_v2 = vld [vmem:[#allocation5 + $0xf0] sm:$0xf]  ;;  %v1624_v3 = vor.u32 %v2228_v1, %v1623_v0  ;;  %v2244_v4 = vld [vmem:[#allocation5 + $0xf4] sm:$0xf0]  ;;  %v1615_v11 = vld [vmem:[#allocation5 + $0x60] sm:$0xf] }
  0x1f   :  { %v1751_v5 = vld [vmem:[#allocation5 + $0x170] sm:$0xf]  ;;  %v2260_v6 = vld [vmem:[#allocation5 + $0x174] sm:$0xf0]  ;;  %v1688_v7 = vor.u32 %v2244_v4, %v1687_v2  ;;  %v2226_v13 = vld [vmem:[#allocation5 + $0x64] sm:$0xf0] }
  0x20   :  { %v1752_v8 = vor.u32 %v2260_v6, %v1751_v5  ;;  %v1815_v9 = vld [vmem:[#allocation5 + $0x1f0] sm:$0xf]  ;;  %v2276_v10 = vld [vmem:[#allocation5 + $0x1f4] sm:$0xf0]  ;;  %947 = vmatpush.bf16.msra.mxu0 %v1624_v3  ;;  %v1679_v14 = vld [vmem:[#allocation5 + $0xe0] sm:$0xf]  ;;  %v1616_v16 = vor.u32 %v2226_v13, %v1615_v11 }
  0x21   :  { %v1816_v12 = vor.u32 %v2276_v10, %v1815_v9  ;;  %v2242_v15 = vld [vmem:[#allocation5 + $0xe4] sm:$0xf0]  ;;  %961 = vmatpush.bf16.msra.mxu1 %v1688_v7  ;;  %v1743_v18 = vld [vmem:[#allocation5 + $0x160] sm:$0xf]  ;;  %v1607_v23 = vld [vmem:[#allocation5 + $0x50] sm:$0xf] }
  0x22   :  { %975 = vmatpush.bf16.msra.mxu2 %v1752_v8  ;;  %v1680_v17 = vor.u32 %v2242_v15, %v1679_v14  ;;  %v2258_v19 = vld [vmem:[#allocation5 + $0x164] sm:$0xf0]  ;;  %v1807_v20 = vld [vmem:[#allocation5 + $0x1e0] sm:$0xf]  ;;  %v2224_v24 = vld [vmem:[#allocation5 + $0x54] sm:$0xf0] }
  0x23   :  { %989 = vmatpush.bf16.msra.mxu3 %v1816_v12  ;;  %v1744_v21 = vor.u32 %v2258_v19, %v1743_v18  ;;  %v2274_v22 = vld [vmem:[#allocation5 + $0x1e4] sm:$0xf0]  ;;  %v1671_v26 = vld [vmem:[#allocation5 + $0xd0] sm:$0xf]  ;;  %v2240_v27 = vld [vmem:[#allocation5 + $0xd4] sm:$0xf0]  ;;  %v1608_v29 = vor.u32 %v2224_v24, %v1607_v23 }
  0x24   :  { %v1808_v25 = vor.u32 %v2274_v22, %v1807_v20  ;;  %v1735_v28 = vld [vmem:[#allocation5 + $0x150] sm:$0xf]  ;;  %948 = vmatpush.bf16.msra.mxu0 %v1616_v16  ;;  %v2256_v30 = vld [vmem:[#allocation5 + $0x154] sm:$0xf0]  ;;  %v1672_v33 = vor.u32 %v2240_v27, %v1671_v26  ;;  %v1599_v35 = vld [vmem:[#allocation5 + $0x40] sm:$0xf] }
  0x25   :  { %v1799_v31 = vld [vmem:[#allocation5 + $0x1d0] sm:$0xf]  ;;  %v2272_v32 = vld [vmem:[#allocation5 + $0x1d4] sm:$0xf0]  ;;  %962 = vmatpush.bf16.msra.mxu1 %v1680_v17  ;;  %v1736_v34 = vor.u32 %v2256_v30, %v1735_v28  ;;  %v2222_v36 = vld [vmem:[#allocation5 + $0x44] sm:$0xf0] }
  0x26   :  { %976 = vmatpush.bf16.msra.mxu2 %v1744_v21  ;;  %v1663_v37 = vld [vmem:[#allocation5 + $0xc0] sm:$0xf]  ;;  %v1800_v38 = vor.u32 %v2272_v32, %v1799_v31  ;;  %v2238_v39 = vld [vmem:[#allocation5 + $0xc4] sm:$0xf0]  ;;  %v1600_v44 = vor.u32 %v2222_v36, %v1599_v35  ;;  %v1591_v47 = vld [vmem:[#allocation5 + $0x30] sm:$0xf] }
  0x27   :  { %990 = vmatpush.bf16.msra.mxu3 %v1808_v25  ;;  %v1727_v40 = vld [vmem:[#allocation5 + $0x140] sm:$0xf]  ;;  %v2254_v41 = vld [vmem:[#allocation5 + $0x144] sm:$0xf0]  ;;  %v1664_v45 = vor.u32 %v2238_v39, %v1663_v37  ;;  %v2220_v48 = vld [vmem:[#allocation5 + $0x34] sm:$0xf0] }
  0x28   :  { %v1791_v42 = vld [vmem:[#allocation5 + $0x1c0] sm:$0xf]  ;;  %v2270_v43 = vld [vmem:[#allocation5 + $0x1c4] sm:$0xf0]  ;;  %949 = vmatpush.bf16.msra.mxu0 %v1608_v29  ;;  %v1728_v46 = vor.u32 %v2254_v41, %v1727_v40  ;;  %v1655_v49 = vld [vmem:[#allocation5 + $0xb0] sm:$0xf]  ;;  %v1592_v56 = vor.u32 %v2220_v48, %v1591_v47 }
  0x29   :  { %963 = vmatpush.bf16.msra.mxu1 %v1672_v33  ;;  %v1792_v50 = vor.u32 %v2270_v43, %v1791_v42  ;;  %v2236_v51 = vld [vmem:[#allocation5 + $0xb4] sm:$0xf0]  ;;  %v1719_v52 = vld [vmem:[#allocation5 + $0x130] sm:$0xf]  ;;  %v1583_v59 = vld [vmem:[#allocation5 + $0x20] sm:$0xf] }
  0x2a   :  { %977 = vmatpush.bf16.msra.mxu2 %v1736_v34  ;;  %v2252_v53 = vld [vmem:[#allocation5 + $0x134] sm:$0xf0]  ;;  %v1783_v54 = vld [vmem:[#allocation5 + $0x1b0] sm:$0xf]  ;;  %v1656_v57 = vor.u32 %v2236_v51, %v1655_v49  ;;  %v2218_v60 = vld [vmem:[#allocation5 + $0x24] sm:$0xf0] }
  0x2b   :  { %991 = vmatpush.bf16.msra.mxu3 %v1800_v38  ;;  %v2268_v55 = vld [vmem:[#allocation5 + $0x1b4] sm:$0xf0]  ;;  %v1720_v58 = vor.u32 %v2252_v53, %v1719_v52  ;;  %v1647_v61 = vld [vmem:[#allocation5 + $0xa0] sm:$0xf]  ;;  %v2234_v63 = vld [vmem:[#allocation5 + $0xa4] sm:$0xf0]  ;;  %v1584_v4 = vor.u32 %v2218_v60, %v1583_v59 }
  0x2c   :  { %950 = vmatpush.bf16.msra.mxu0 %v1600_v44  ;;  %v1784_v62 = vor.u32 %v2268_v55, %v1783_v54  ;;  %v1711_v0 = vld [vmem:[#allocation5 + $0x120] sm:$0xf]  ;;  %v2250_v1 = vld [vmem:[#allocation5 + $0x124] sm:$0xf0]  ;;  %v1648_v5 = vor.u32 %v2234_v63, %v1647_v61  ;;  %v1575_v7 = vld [vmem:[#allocation5 + $0x10] sm:$0xf] }
  0x2d   :  { %964 = vmatpush.bf16.msra.mxu1 %v1664_v45  ;;  %v1775_v2 = vld [vmem:[#allocation5 + $0x1a0] sm:$0xf]  ;;  %v2266_v3 = vld [vmem:[#allocation5 + $0x1a4] sm:$0xf0]  ;;  %v1712_v6 = vor.u32 %v2250_v1, %v1711_v0  ;;  %v2216_v8 = vld [vmem:[#allocation5 + $0x14] sm:$0xf0] }
  0x2e   :  { %978 = vmatpush.bf16.msra.mxu2 %v1728_v46  ;;  %v1639_v9 = vld [vmem:[#allocation5 + $0x90] sm:$0xf]  ;;  %v1776_v10 = vor.u32 %v2266_v3, %v1775_v2  ;;  %v2232_v11 = vld [vmem:[#allocation5 + $0x94] sm:$0xf0]  ;;  %v1576_v16 = vor.u32 %v2216_v8, %v1575_v7  ;;  %v1567_v17 = vld [vmem:[#allocation5] sm:$0xf] }
  0x2f   :  { %992 = vmatpush.bf16.msra.mxu3 %v1792_v50  ;;  %v1703_v12 = vld [vmem:[#allocation5 + $0x110] sm:$0xf]  ;;  %v2248_v13 = vld [vmem:[#allocation5 + $0x114] sm:$0xf0]  ;;  %v2214_v18 = vld [vmem:[#allocation5 + $0x4] sm:$0xf0]  ;;  %v1640_v19 = vor.u32 %v2232_v11, %v1639_v9 }
  0x30   :  { %951 = vmatpush.bf16.msra.mxu0 %v1592_v56  ;;  %v1767_v14 = vld [vmem:[#allocation5 + $0x190] sm:$0xf]  ;;  %v2264_v15 = vld [vmem:[#allocation5 + $0x194] sm:$0xf0]  ;;  %v1704_v20 = vor.u32 %v2248_v13, %v1703_v12  ;;  %v1631_v21 = vld [vmem:[#allocation5 + $0x80] sm:$0xf]  ;;  %v1568_v31 = vor.u32 %v2214_v18, %v1567_v17 }
  0x31   :  { %965 = vmatpush.bf16.msra.mxu1 %v1656_v57  ;;  %v2230_v22 = vld [vmem:[#allocation5 + $0x84] sm:$0xf0]  ;;  %v1695_v23 = vld [vmem:[#allocation5 + $0x100] sm:$0xf]  ;;  %v1768_v24 = vor.u32 %v2264_v15, %v1767_v14  ;;  %v1879_v28 = vld [vmem:[#allocation5 + $0x270] sm:$0xf] }
  0x32   :  { %979 = vmatpush.bf16.msra.mxu2 %v1720_v58  ;;  %v2246_v25 = vld [vmem:[#allocation5 + $0x104] sm:$0xf0]  ;;  %v1759_v26 = vld [vmem:[#allocation5 + $0x180] sm:$0xf]  ;;  %v2292_v29 = vld [vmem:[#allocation5 + $0x274] sm:$0xf0]  ;;  %v1632_v35 = vor.u32 %v2230_v22, %v1631_v21 }
  0x33   :  { %993 = vmatpush.bf16.msra.mxu3 %v1784_v62  ;;  %v2262_v27 = vld [vmem:[#allocation5 + $0x184] sm:$0xf0]  ;;  %v1943_v30 = vld [vmem:[#allocation5 + $0x2f0] sm:$0xf]  ;;  %v2308_v32 = vld [vmem:[#allocation5 + $0x2f4] sm:$0xf0]  ;;  %v1696_v36 = vor.u32 %v2246_v25, %v1695_v23  ;;  %v1880_v40 = vor.u32 %v2292_v29, %v1879_v28 }
  0x34   :  { %952 = vmatpush.bf16.msra.mxu0 %v1584_v4  ;;  %v2007_v33 = vld [vmem:[#allocation5 + $0x370] sm:$0xf]  ;;  %v2324_v34 = vld [vmem:[#allocation5 + $0x374] sm:$0xf0]  ;;  %v1760_v39 = vor.u32 %v2262_v27, %v1759_v26  ;;  %v1871_v41 = vld [vmem:[#allocation5 + $0x260] sm:$0xf]  ;;  %v1944_v43 = vor.u32 %v2308_v32, %v1943_v30 }
  0x35   :  { %966 = vmatpush.bf16.msra.mxu1 %v1648_v5  ;;  %v2071_v37 = vld [vmem:[#allocation5 + $0x3f0] sm:$0xf]  ;;  %v2340_v38 = vld [vmem:[#allocation5 + $0x3f4] sm:$0xf0]  ;;  %v2290_v42 = vld [vmem:[#allocation5 + $0x264] sm:$0xf0]  ;;  %v2008_v44 = vor.u32 %v2324_v34, %v2007_v33 }
  0x36   :  { %980 = vmatpush.bf16.msra.mxu2 %v1712_v6  ;;  %v1935_v45 = vld [vmem:[#allocation5 + $0x2e0] sm:$0xf]  ;;  %v2306_v46 = vld [vmem:[#allocation5 + $0x2e4] sm:$0xf0]  ;;  %v2072_v48 = vor.u32 %v2340_v38, %v2071_v37  ;;  %v1872_v55 = vor.u32 %v2290_v42, %v1871_v41  ;;  %v1863_v56 = vld [vmem:[#allocation5 + $0x250] sm:$0xf] }
  0x37   :  { %994 = vmatpush.bf16.msra.mxu3 %v1776_v10  ;;  %v1999_v47 = vld [vmem:[#allocation5 + $0x360] sm:$0xf]  ;;  %v2322_v49 = vld [vmem:[#allocation5 + $0x364] sm:$0xf0]  ;;  %v2288_v57 = vld [vmem:[#allocation5 + $0x254] sm:$0xf0]  ;;  %v1936_v60 = vor.u32 %v2306_v46, %v1935_v45 }
  0x38   :  { %953 = vmatpush.bf16.msra.mxu0 %v1576_v16  ;;  %v2063_v50 = vld [vmem:[#allocation5 + $0x3e0] sm:$0xf]  ;;  %v2338_v51 = vld [vmem:[#allocation5 + $0x3e4] sm:$0xf0]  ;;  %v2000_v61 = vor.u32 %v2322_v49, %v1999_v47  ;;  %v1927_v62 = vld [vmem:[#allocation5 + $0x2d0] sm:$0xf]  ;;  %v1864_v9 = vor.u32 %v2288_v57, %v1863_v56 }
  0x39   :  { %967 = vmatpush.bf16.msra.mxu1 %v1640_v19  ;;  %v1535_v52 = vld [vmem:[#allocation2] sm:$0xf]  ;;  %v1543_v54 = vld [vmem:[#allocation2 + $0x8] sm:$0xf]  ;;  %v2304_v63 = vld [vmem:[#allocation5 + $0x2d4] sm:$0xf0]  ;;  %v2064_v2 = vor.u32 %v2338_v51, %v2063_v50 }
  0x3a   :  { %981 = vmatpush.bf16.msra.mxu2 %v1704_v20  ;;  %v2209_v53 = vld [vmem:[#allocation2 + $0x1c] sm:$0xf0]  ;;  %v2210_v59 = vld [vmem:[#allocation2 + $0x24] sm:$0xf0]  ;;  %v1991_v0 = vld [vmem:[#allocation5 + $0x350] sm:$0xf]  ;;  %v1928_v12 = vor.u32 %v2304_v63, %v1927_v62 }
  0x3b   :  { %995 = vmatpush.bf16.msra.mxu3 %v1768_v24  ;;  %v2662_v58 = vor.u32 %v2209_v53, %v1535_v52  ;;  %v2664_v1 = vor.u32 %v2210_v59, %v1543_v54  ;;  %v2320_v3 = vld [vmem:[#allocation5 + $0x354] sm:$0xf0]  ;;  %v2055_v4 = vld [vmem:[#allocation5 + $0x3d0] sm:$0xf]  ;;  %v2205_v6 = vld [vmem:[#allocation2 + $0x4] sm:$0xf] }
  0x3c   :  { %954 = vmatpush.bf16.msra.mxu0 %v1568_v31  ;;  %v2336_v5 = vld [vmem:[#allocation5 + $0x3d4] sm:$0xf0]  ;;  %v1537_v7 = vld [vmem:[#allocation2 + $0x20] sm:$0xf0]  ;;  %v2206_v8 = vld [vmem:[#allocation2 + $0xc] sm:$0xf]  ;;  %v1992_v13 = vor.u32 %v2320_v3, %v1991_v0 }
  0x3d   :  { %968 = vmatpush.bf16.msra.mxu1 %v1632_v35  ;;  %v2668_v10 = vor.u32 %v2205_v6, %v1537_v7  ;;  %v1545_v11 = vld [vmem:[#allocation2 + $0x28] sm:$0xf0]  ;;  %v1855_v14 = vld [vmem:[#allocation5 + $0x240] sm:$0xf]  ;;  %v2286_v15 = vld [vmem:[#allocation5 + $0x244] sm:$0xf0]  ;;  %v2056_v18 = vor.u32 %v2336_v5, %v2055_v4 }
  0x3e   :  { %982 = vmatpush.bf16.msra.mxu2 %v1696_v36  ;;  %v1919_v16 = vld [vmem:[#allocation5 + $0x2c0] sm:$0xf]  ;;  %v2670_v17 = vor.u32 %v2206_v8, %v1545_v11  ;;  %v2302_v19 = vld [vmem:[#allocation5 + $0x2c4] sm:$0xf0]  ;;  %v1856_v24 = vor.u32 %v2286_v15, %v1855_v14  ;;  %v1847_v27 = vld [vmem:[#allocation5 + $0x230] sm:$0xf] }
  0x3f   :  { %996 = vmatpush.bf16.msra.mxu3 %v1760_v39  ;;  %955 = vmatmul.bf16.vlgmr.msra.gmra.mxu0 %v2662_v58  ;;  %v1983_v20 = vld [vmem:[#allocation5 + $0x340] sm:$0xf]  ;;  %v2318_v21 = vld [vmem:[#allocation5 + $0x344] sm:$0xf0]  ;;  %v1920_v25 = vor.u32 %v2302_v19, %v1919_v16  ;;  %v2284_v28 = vld [vmem:[#allocation5 + $0x234] sm:$0xf0] }
  0x40   :  { %1003 = vmatpush.bf16.msrb.mxu0 %v1880_v40  ;;  %969 = vmatmul.bf16.vlgmr.msra.gmra.mxu1 %v2668_v10  ;;  %v2047_v22 = vld [vmem:[#allocation5 + $0x3c0] sm:$0xf]  ;;  %v2334_v23 = vld [vmem:[#allocation5 + $0x3c4] sm:$0xf0]  ;;  %v1984_v26 = vor.u32 %v2318_v21, %v1983_v20  ;;  %v1911_v29 = vld [vmem:[#allocation5 + $0x2b0] sm:$0xf]  ;;  %v1848_v36 = vor.u32 %v2284_v28, %v1847_v27 }
  0x41   :  { %1017 = vmatpush.bf16.msrb.mxu1 %v1944_v43  ;;  %983 = vmatmul.bf16.vlgmr.msra.gmra.mxu2 %v2664_v1  ;;  %v2048_v30 = vor.u32 %v2334_v23, %v2047_v22  ;;  %v2300_v31 = vld [vmem:[#allocation5 + $0x2b4] sm:$0xf0]  ;;  %v1975_v32 = vld [vmem:[#allocation5 + $0x330] sm:$0xf]  ;;  %v1839_v39 = vld [vmem:[#allocation5 + $0x220] sm:$0xf] }
  0x42   :  { %1031 = vmatpush.bf16.msrb.mxu2 %v2008_v44  ;;  %997 = vmatmul.bf16.vlgmr.msra.gmra.mxu3 %v2670_v17  ;;  %v2316_v33 = vld [vmem:[#allocation5 + $0x334] sm:$0xf0]  ;;  %v2039_v34 = vld [vmem:[#allocation5 + $0x3b0] sm:$0xf]  ;;  %v1912_v37 = vor.u32 %v2300_v31, %v1911_v29  ;;  %v2282_v40 = vld [vmem:[#allocation5 + $0x224] sm:$0xf0] }
  0x43   :  { %1045 = vmatpush.bf16.msrb.mxu3 %v2072_v48  ;;  %v2332_v35 = vld [vmem:[#allocation5 + $0x3b4] sm:$0xf0]  ;;  %v1976_v38 = vor.u32 %v2316_v33, %v1975_v32  ;;  %v1903_v41 = vld [vmem:[#allocation5 + $0x2a0] sm:$0xf]  ;;  %v2298_v43 = vld [vmem:[#allocation5 + $0x2a4] sm:$0xf0]  ;;  %v1840_v48 = vor.u32 %v2282_v40, %v1839_v39 }
  0x44   :  { %1004 = vmatpush.bf16.msrb.mxu0 %v1872_v55  ;;  %v2040_v42 = vor.u32 %v2332_v35, %v2039_v34  ;;  %v1967_v44 = vld [vmem:[#allocation5 + $0x320] sm:$0xf]  ;;  %v2314_v45 = vld [vmem:[#allocation5 + $0x324] sm:$0xf0]  ;;  %v1831_v49 = vld [vmem:[#allocation5 + $0x210] sm:$0xf]  ;;  %v1904_v50 = vor.u32 %v2298_v43, %v1903_v41 }
  0x45   :  { %1018 = vmatpush.bf16.msrb.mxu1 %v1936_v60  ;;  %v2031_v46 = vld [vmem:[#allocation5 + $0x3a0] sm:$0xf]  ;;  %v2330_v47 = vld [vmem:[#allocation5 + $0x3a4] sm:$0xf0]  ;;  %v1968_v51 = vor.u32 %v2314_v45, %v1967_v44  ;;  %v2280_v52 = vld [vmem:[#allocation5 + $0x214] sm:$0xf0] }
  0x46   :  { %1032 = vmatpush.bf16.msrb.mxu2 %v2000_v61  ;;  %v1895_v53 = vld [vmem:[#allocation5 + $0x290] sm:$0xf]  ;;  %v2296_v54 = vld [vmem:[#allocation5 + $0x294] sm:$0xf0]  ;;  %v2032_v55 = vor.u32 %v2330_v47, %v2031_v46  ;;  %v1823_v61 = vld [vmem:[#allocation5 + $0x200] sm:$0xf]  ;;  %v1832_v63 = vor.u32 %v2280_v52, %v1831_v49 }
  0x47   :  { %1046 = vmatpush.bf16.msrb.mxu3 %v2064_v2  ;;  %v1959_v56 = vld [vmem:[#allocation5 + $0x310] sm:$0xf]  ;;  %v2312_v57 = vld [vmem:[#allocation5 + $0x314] sm:$0xf0]  ;;  %v2278_v62 = vld [vmem:[#allocation5 + $0x204] sm:$0xf0]  ;;  %v1896_v5 = vor.u32 %v2296_v54, %v1895_v53 }
  0x48   :  { %1005 = vmatpush.bf16.msrb.mxu0 %v1864_v9  ;;  %v2023_v59 = vld [vmem:[#allocation5 + $0x390] sm:$0xf]  ;;  %v2328_v60 = vld [vmem:[#allocation5 + $0x394] sm:$0xf0]  ;;  %v1887_v0 = vld [vmem:[#allocation5 + $0x280] sm:$0xf]  ;;  %v1960_v6 = vor.u32 %v2312_v57, %v1959_v56  ;;  %v1824_v19 = vor.u32 %v2278_v62, %v1823_v61 }
  0x49   :  { %1019 = vmatpush.bf16.msrb.mxu1 %v1928_v12  ;;  %v2294_v2 = vld [vmem:[#allocation5 + $0x284] sm:$0xf0]  ;;  %v1951_v3 = vld [vmem:[#allocation5 + $0x300] sm:$0xf]  ;;  %v2227_v9 = vld [vmem:[#allocation5 + $0x74] sm:$0xf]  ;;  %v2024_v11 = vor.u32 %v2328_v60, %v2023_v59 }
  0x4a   :  { %1033 = vmatpush.bf16.msrb.mxu2 %v1992_v13  ;;  %v2310_v4 = vld [vmem:[#allocation5 + $0x304] sm:$0xf0]  ;;  %v2015_v7 = vld [vmem:[#allocation5 + $0x380] sm:$0xf]  ;;  %v1625_v12 = vld [vmem:[#allocation5 + $0x78] sm:$0xf0]  ;;  %v1888_v23 = vor.u32 %v2294_v2, %v1887_v0 }
  0x4b   :  { %1047 = vmatpush.bf16.msrb.mxu3 %v2056_v18  ;;  %v2326_v8 = vld [vmem:[#allocation5 + $0x384] sm:$0xf0]  ;;  %v2243_v13 = vld [vmem:[#allocation5 + $0xf4] sm:$0xf]  ;;  %v1689_v14 = vld [vmem:[#allocation5 + $0xf8] sm:$0xf0]  ;;  %v1628_v29 = vor.u32 %v2227_v9, %v1625_v12 }
  0x4c   :  { %1006 = vmatpush.bf16.msrb.mxu0 %v1856_v24  ;;  %v2259_v15 = vld [vmem:[#allocation5 + $0x174] sm:$0xf]  ;;  %v1753_v16 = vld [vmem:[#allocation5 + $0x178] sm:$0xf0]  ;;  %v1551_v21 = vld [vmem:[#allocation2 + $0x10] sm:$0xf]  ;;  %v1952_v24 = vor.u32 %v2310_v4, %v1951_v3  ;;  %v2016_v28 = vor.u32 %v2326_v8, %v2015_v7  ;;  %v1692_v33 = vor.u32 %v2243_v13, %v1689_v14 }
  0x4d   :  { %1020 = vmatpush.bf16.msrb.mxu1 %v1920_v25  ;;  %v2275_v18 = vld [vmem:[#allocation5 + $0x1f4] sm:$0xf]  ;;  %v1817_v20 = vld [vmem:[#allocation5 + $0x1f8] sm:$0xf0]  ;;  %v2211_v22 = vld [vmem:[#allocation2 + $0x2c] sm:$0xf0]  ;;  %v1756_v34 = vor.u32 %v2259_v15, %v1753_v16 }
  0x4e   :  { %1034 = vmatpush.bf16.msrb.mxu2 %v1984_v26  ;;  %v1559_v25 = vld [vmem:[#allocation2 + $0x18] sm:$0xf]  ;;  %v2207_v27 = vld [vmem:[#allocation2 + $0x14] sm:$0xf]  ;;  %v2208_v31 = vld [vmem:[#allocation2 + $0x1c] sm:$0xf]  ;;  %v2674_v39 = vor.u32 %v2211_v22, %v1551_v21 }
  0x4f   :  { %1048 = vmatpush.bf16.msrb.mxu3 %v2048_v30  ;;  %v2212_v26 = vld [vmem:[#allocation2 + $0x34] sm:$0xf0]  ;;  %v1553_v30 = vld [vmem:[#allocation2 + $0x30] sm:$0xf0]  ;;  %v1561_v32 = vld [vmem:[#allocation2 + $0x38] sm:$0xf0] }
  0x50   :  { %1007 = vmatpush.bf16.msrb.mxu0 %v1848_v36  ;;  %v2225_v35 = vld [vmem:[#allocation5 + $0x64] sm:$0xf]  ;;  %v1617_v36 = vld [vmem:[#allocation5 + $0x68] sm:$0xf0]  ;;  %v2676_v43 = vor.u32 %v2212_v26, %v1559_v25  ;;  %v2678_v44 = vor.u32 %v2207_v27, %v1553_v30  ;;  %v2680_v47 = vor.u32 %v2208_v31, %v1561_v32  ;;  %v1609_v52 = vld [vmem:[#allocation5 + $0x58] sm:$0xf0] }
  0x51   :  { %1021 = vmatpush.bf16.msrb.mxu1 %v1912_v37  ;;  %v2241_v37 = vld [vmem:[#allocation5 + $0xe4] sm:$0xf]  ;;  %v1681_v40 = vld [vmem:[#allocation5 + $0xe8] sm:$0xf0]  ;;  %v2239_v53 = vld [vmem:[#allocation5 + $0xd4] sm:$0xf] }
  0x52   :  { %1035 = vmatpush.bf16.msrb.mxu2 %v1976_v38  ;;  %v1820_v38 = vor.u32 %v2275_v18, %v1817_v20  ;;  %v2257_v41 = vld [vmem:[#allocation5 + $0x164] sm:$0xf]  ;;  %v1809_v46 = vld [vmem:[#allocation5 + $0x1e8] sm:$0xf0]  ;;  %v1684_v49 = vor.u32 %v2241_v37, %v1681_v40  ;;  %v2255_v56 = vld [vmem:[#allocation5 + $0x154] sm:$0xf] }
  0x53   :  { %1049 = vmatpush.bf16.msrb.mxu3 %v2040_v42  ;;  %v1745_v42 = vld [vmem:[#allocation5 + $0x168] sm:$0xf0]  ;;  %v2273_v45 = vld [vmem:[#allocation5 + $0x1e4] sm:$0xf]  ;;  %v1737_v57 = vld [vmem:[#allocation5 + $0x158] sm:$0xf0] }
  0x54   :  { %1008 = vmatpush.bf16.msrb.mxu0 %v1840_v48  ;;  %v1620_v48 = vor.u32 %v2225_v35, %v1617_v36  ;;  %v1812_v54 = vor.u32 %v2273_v45, %v1809_v46  ;;  %v2271_v59 = vld [vmem:[#allocation5 + $0x1d4] sm:$0xf]  ;;  %v1801_v60 = vld [vmem:[#allocation5 + $0x1d8] sm:$0xf0]  ;;  %v2221_v0 = vld [vmem:[#allocation5 + $0x44] sm:$0xf] }
  0x55   :  { %1022 = vmatpush.bf16.msrb.mxu1 %v1904_v50  ;;  %v1748_v50 = vor.u32 %v2257_v41, %v1745_v42  ;;  %v1601_v2 = vld [vmem:[#allocation5 + $0x48] sm:$0xf0]  ;;  %v2237_v3 = vld [vmem:[#allocation5 + $0xc4] sm:$0xf]  ;;  %v1804_v4 = vor.u32 %v2271_v59, %v1801_v60  ;;  %v2219_v14 = vld [vmem:[#allocation5 + $0x34] sm:$0xf] }
  0x56   :  { %1036 = vmatpush.bf16.msrb.mxu2 %v1968_v51  ;;  %v2223_v51 = vld [vmem:[#allocation5 + $0x54] sm:$0xf]  ;;  %v1729_v7 = vld [vmem:[#allocation5 + $0x148] sm:$0xf0]  ;;  %v2269_v8 = vld [vmem:[#allocation5 + $0x1c4] sm:$0xf] }
  0x57   :  { %1050 = vmatpush.bf16.msrb.mxu3 %v2032_v55  ;;  %v1673_v55 = vld [vmem:[#allocation5 + $0xd8] sm:$0xf0]  ;;  %v1612_v61 = vor.u32 %v2223_v51, %v1609_v52  ;;  %v1793_v9 = vld [vmem:[#allocation5 + $0x1c8] sm:$0xf0]  ;;  %v2235_v16 = vld [vmem:[#allocation5 + $0xb4] sm:$0xf] }
  0x58   :  { %1009 = vmatpush.bf16.msrb.mxu0 %v1832_v63  ;;  %v1676_v62 = vor.u32 %v2239_v53, %v1673_v55  ;;  %v1740_v63 = vor.u32 %v2255_v56, %v1737_v57  ;;  %v1593_v15 = vld [vmem:[#allocation5 + $0x38] sm:$0xf0]  ;;  %v1796_v18 = vor.u32 %v2269_v8, %v1793_v9  ;;  %v2251_v20 = vld [vmem:[#allocation5 + $0x134] sm:$0xf]  ;;  %v2217_v27 = vld [vmem:[#allocation5 + $0x24] sm:$0xf] }
  0x59   :  { %1023 = vmatpush.bf16.msrb.mxu1 %v1896_v5  ;;  %v1665_v5 = vld [vmem:[#allocation5 + $0xc8] sm:$0xf0]  ;;  %v1721_v21 = vld [vmem:[#allocation5 + $0x138] sm:$0xf0]  ;;  %v2267_v22 = vld [vmem:[#allocation5 + $0x1b4] sm:$0xf] }
  0x5a   :  { %1037 = vmatpush.bf16.msrb.mxu2 %v1960_v6  ;;  %v2253_v6 = vld [vmem:[#allocation5 + $0x144] sm:$0xf]  ;;  %v1668_v12 = vor.u32 %v2237_v3, %v1665_v5  ;;  %v1724_v26 = vor.u32 %v2251_v20, %v1721_v21  ;;  %v1649_v31 = vld [vmem:[#allocation5 + $0xa8] sm:$0xf0]  ;;  %v2215_v40 = vld [vmem:[#allocation5 + $0x14] sm:$0xf] }
  0x5b   :  { %1051 = vmatpush.bf16.msrb.mxu3 %v2024_v11  ;;  %v1604_v11 = vor.u32 %v2221_v0, %v1601_v2  ;;  %v1732_v13 = vor.u32 %v2253_v6, %v1729_v7  ;;  %v2249_v32 = vld [vmem:[#allocation5 + $0x124] sm:$0xf]  ;;  %v1777_v35 = vld [vmem:[#allocation5 + $0x1a8] sm:$0xf0]  ;;  %v1577_v41 = vld [vmem:[#allocation5 + $0x18] sm:$0xf0] }
  0x5c   :  { %1010 = vmatpush.bf16.msrb.mxu0 %v1824_v19  ;;  %v1657_v19 = vld [vmem:[#allocation5 + $0xb8] sm:$0xf0]  ;;  %v2231_v42 = vld [vmem:[#allocation5 + $0x94] sm:$0xf]  ;;  %v1580_v52 = vor.u32 %v2215_v40, %v1577_v41  ;;  %v2213_v53 = vld [vmem:[#allocation5 + $0x4] sm:$0xf] }
  0x5d   :  { %1024 = vmatpush.bf16.msrb.mxu1 %v1888_v23  ;;  %v1785_v23 = vld [vmem:[#allocation5 + $0x1b8] sm:$0xf0]  ;;  %v1660_v25 = vor.u32 %v2235_v16, %v1657_v19  ;;  %v2229_v57 = vld [vmem:[#allocation5 + $0x84] sm:$0xf]  ;;  %v1633_v59 = vld [vmem:[#allocation5 + $0x88] sm:$0xf0] }
  0x5e   :  { %1038 = vmatpush.bf16.msrb.mxu2 %v1952_v24  ;;  %v1596_v24 = vor.u32 %v2219_v14, %v1593_v15  ;;  %v1788_v30 = vor.u32 %v2267_v22, %v1785_v23  ;;  %v1641_v46 = vld [vmem:[#allocation5 + $0x98] sm:$0xf0]  ;;  %v2245_v60 = vld [vmem:[#allocation5 + $0x104] sm:$0xf]  ;;  %v1761_v0 = vld [vmem:[#allocation5 + $0x188] sm:$0xf0]  ;;  %v1636_v9 = vor.u32 %v2229_v57, %v1633_v59 }
  0x5f   :  { %1052 = vmatpush.bf16.msrb.mxu3 %v2016_v28  ;;  %1011 = vmatmul.bf16.vlgmr.msrb.gmra.mxu0 %v2674_v39  ;;  %v1585_v28 = vld [vmem:[#allocation5 + $0x28] sm:$0xf0]  ;;  %v1769_v51 = vld [vmem:[#allocation5 + $0x198] sm:$0xf0]  ;;  %v1644_v55 = vor.u32 %v2231_v42, %v1641_v46  ;;  %v2291_v2 = vld [vmem:[#allocation5 + $0x274] sm:$0xf] }
  0x60   :  { %1059 = vmatpush.bf16.msra.mxu0 %v1628_v29  ;;  %1025 = vmatmul.bf16.vlgmr.msrb.gmra.mxu1 %v2678_v44  ;;  %v2233_v29 = vld [vmem:[#allocation5 + $0xa4] sm:$0xf]  ;;  %v1588_v36 = vor.u32 %v2217_v27, %v1585_v28  ;;  %v1881_v3 = vld [vmem:[#allocation5 + $0x278] sm:$0xf0]  ;;  %v2323_v7 = vld [vmem:[#allocation5 + $0x374] sm:$0xf] }
  0x61   :  { %1073 = vmatpush.bf16.msra.mxu1 %v1692_v33  ;;  %1039 = vmatmul.bf16.vlgmr.msrb.gmra.mxu2 %v2676_v43  ;;  %v1713_v33 = vld [vmem:[#allocation5 + $0x128] sm:$0xf0]  ;;  %v1652_v37 = vor.u32 %v2233_v29, %v1649_v31  ;;  %v1945_v6 = vld [vmem:[#allocation5 + $0x2f8] sm:$0xf0]  ;;  %v1884_v15 = vor.u32 %v2291_v2, %v1881_v3  ;;  %v2289_v16 = vld [vmem:[#allocation5 + $0x264] sm:$0xf] }
  0x62   :  { %1087 = vmatpush.bf16.msra.mxu2 %v1756_v34  ;;  %1053 = vmatmul.bf16.vlgmr.msrb.gmra.mxu3 %v2680_v47  ;;  %v2265_v34 = vld [vmem:[#allocation5 + $0x1a4] sm:$0xf]  ;;  %v2009_v8 = vld [vmem:[#allocation5 + $0x378] sm:$0xf0]  ;;  %v1937_v22 = vld [vmem:[#allocation5 + $0x2e8] sm:$0xf0] }
  0x63   :  { %1101 = vmatpush.bf16.msra.mxu3 %v1820_v38  ;;  %v1716_v38 = vor.u32 %v2249_v32, %v1713_v33  ;;  %v1780_v45 = vor.u32 %v2265_v34, %v1777_v35  ;;  %v2305_v19 = vld [vmem:[#allocation5 + $0x2e4] sm:$0xf]  ;;  %v2012_v21 = vor.u32 %v2323_v7, %v2009_v8  ;;  %v2065_v27 = vld [vmem:[#allocation5 + $0x3e8] sm:$0xf0]  ;;  %v2287_v31 = vld [vmem:[#allocation5 + $0x254] sm:$0xf] }
  0x64   :  { %1060 = vmatpush.bf16.msra.mxu0 %v1620_v48  ;;  %v2247_v48 = vld [vmem:[#allocation5 + $0x114] sm:$0xf]  ;;  %v2321_v23 = vld [vmem:[#allocation5 + $0x364] sm:$0xf]  ;;  %v1940_v29 = vor.u32 %v2305_v19, %v1937_v22  ;;  %v1865_v32 = vld [vmem:[#allocation5 + $0x258] sm:$0xf0] }
  0x65   :  { %1074 = vmatpush.bf16.msra.mxu1 %v1684_v49  ;;  %v1705_v49 = vld [vmem:[#allocation5 + $0x118] sm:$0xf0]  ;;  %v2303_v33 = vld [vmem:[#allocation5 + $0x2d4] sm:$0xf]  ;;  %v1868_v41 = vor.u32 %v2287_v31, %v1865_v32  ;;  %v2285_v46 = vld [vmem:[#allocation5 + $0x244] sm:$0xf] }
  0x66   :  { %1088 = vmatpush.bf16.msra.mxu2 %v1748_v50  ;;  %v2263_v50 = vld [vmem:[#allocation5 + $0x194] sm:$0xf]  ;;  %v1708_v56 = vor.u32 %v2247_v48, %v1705_v49  ;;  %v1929_v35 = vld [vmem:[#allocation5 + $0x2d8] sm:$0xf0]  ;;  %v1857_v48 = vld [vmem:[#allocation5 + $0x248] sm:$0xf0] }
  0x67   :  { %1102 = vmatpush.bf16.msra.mxu3 %v1812_v54  ;;  %v1569_v54 = vld [vmem:[#allocation5 + $0x8] sm:$0xf0]  ;;  %v2057_v40 = vld [vmem:[#allocation5 + $0x3d8] sm:$0xf0]  ;;  %v1932_v42 = vor.u32 %v2303_v33, %v1929_v35  ;;  %v2299_v57 = vld [vmem:[#allocation5 + $0x2b4] sm:$0xf] }
  0x68   :  { %1061 = vmatpush.bf16.msra.mxu0 %v1612_v61  ;;  %v1772_v61 = vor.u32 %v2263_v50, %v1769_v51  ;;  %v1572_v5 = vor.u32 %v2213_v53, %v1569_v54  ;;  %v1921_v50 = vld [vmem:[#allocation5 + $0x2c8] sm:$0xf0]  ;;  %v2317_v51 = vld [vmem:[#allocation5 + $0x344] sm:$0xf]  ;;  %v2279_v19 = vld [vmem:[#allocation5 + $0x214] sm:$0xf] }
  0x69   :  { %1075 = vmatpush.bf16.msra.mxu1 %v1676_v62  ;;  %v1697_v62 = vld [vmem:[#allocation5 + $0x108] sm:$0xf0]  ;;  %v2333_v53 = vld [vmem:[#allocation5 + $0x3c4] sm:$0xf]  ;;  %s2584_s24 = smov [#allocation13]   ;;  %s1517_s27 = sshll.u32 %s2722_s9, 4  ;;  %s1518_s27 = int_to_ptr.hbm [resolvable:$true] %s1517_s27 }
  0x6a   :  { %1089 = vmatpush.bf16.msra.mxu2 %v1740_v63  ;;  %v2261_v63 = vld [vmem:[#allocation5 + $0x184] sm:$0xf]  ;;  %v1825_v32 = vld [vmem:[#allocation5 + $0x208] sm:$0xf0]  ;;  %s1515_s25 = sshll.u32 %s2584_s24, 4  ;;  %s1516_s25 = int_to_ptr.vmem [resolvable:$true] %s1515_s25 }
  0x6b   :  { %1103 = vmatpush.bf16.msra.mxu3 %v1804_v4  ;;  %v2307_v4 = vld [vmem:[#allocation5 + $0x2f4] sm:$0xf]  ;;  %v1764_v14 = vor.u32 %v2261_v63, %v1761_v0  ;;  %v2041_v0 = vld [vmem:[#allocation5 + $0x3b8] sm:$0xf0]  ;;  %v2297_v7 = vld [vmem:[#allocation5 + $0x2a4] sm:$0xf] }
  0x6c   :  { %1062 = vmatpush.bf16.msra.mxu0 %v1604_v11  ;;  %v1700_v11 = vor.u32 %v2245_v60, %v1697_v62  ;;  %v1948_v20 = vor.u32 %v2307_v4, %v1945_v6  ;;  %v1913_v60 = vld [vmem:[#allocation5 + $0x2b8] sm:$0xf0]  ;;  %v2331_v63 = vld [vmem:[#allocation5 + $0x3b4] sm:$0xf]  ;;  %v1841_v6 = vld [vmem:[#allocation5 + $0x228] sm:$0xf0] }
  0x6d   :  { %1076 = vmatpush.bf16.msra.mxu1 %v1668_v12  ;;  %v2339_v12 = vld [vmem:[#allocation5 + $0x3f4] sm:$0xf]  ;;  %v1977_v62 = vld [vmem:[#allocation5 + $0x338] sm:$0xf0]  ;;  %v1916_v3 = vor.u32 %v2299_v57, %v1913_v60  ;;  %v2044_v8 = vor.u32 %v2331_v63, %v2041_v0  ;;  %v2277_v31 = vld [vmem:[#allocation5 + $0x204] sm:$0xf] }
  0x6e   :  { %1090 = vmatpush.bf16.msra.mxu2 %v1732_v13  ;;  %v2073_v13 = vld [vmem:[#allocation5 + $0x3f8] sm:$0xf0]  ;;  %v2293_v33 = vld [vmem:[#allocation5 + $0x284] sm:$0xf]  ;;  %v1889_v35 = vld [vmem:[#allocation5 + $0x288] sm:$0xf0] }
  0x6f   :  { %1104 = vmatpush.bf16.msra.mxu3 %v1796_v18  ;;  %v1873_v18 = vld [vmem:[#allocation5 + $0x268] sm:$0xf0] }
  0x70   :  { %1063 = vmatpush.bf16.msra.mxu0 %v1596_v24  ;;  %v2076_v24 = vor.u32 %v2339_v12, %v2073_v13  ;;  %v1876_v28 = vor.u32 %v2289_v16, %v1873_v18  ;;  %v1969_v12 = vld [vmem:[#allocation5 + $0x328] sm:$0xf0]  ;;  %v2329_v13 = vld [vmem:[#allocation5 + $0x3a4] sm:$0xf] }
  0x71   :  { %1077 = vmatpush.bf16.msra.mxu1 %v1660_v25  ;;  %v2001_v25 = vld [vmem:[#allocation5 + $0x368] sm:$0xf0] }
  0x72   :  { %1091 = vmatpush.bf16.msra.mxu2 %v1724_v26  ;;  %v2337_v26 = vld [vmem:[#allocation5 + $0x3e4] sm:$0xf] }
  0x73   :  { %1105 = vmatpush.bf16.msra.mxu3 %v1788_v30  ;;  %v2004_v30 = vor.u32 %v2321_v23, %v2001_v25  ;;  %v2068_v34 = vor.u32 %v2337_v26, %v2065_v27  ;;  %v1897_v23 = vld [vmem:[#allocation5 + $0x298] sm:$0xf0]  ;;  %v2327_v26 = vld [vmem:[#allocation5 + $0x394] sm:$0xf] }
  0x74   :  { %1064 = vmatpush.bf16.msra.mxu0 %v1588_v36  ;;  %v2319_v36 = vld [vmem:[#allocation5 + $0x354] sm:$0xf]  ;;  %v1961_v25 = vld [vmem:[#allocation5 + $0x318] sm:$0xf0] }
  0x75   :  { %1078 = vmatpush.bf16.msra.mxu1 %v1652_v37  ;;  %v1993_v37 = vld [vmem:[#allocation5 + $0x358] sm:$0xf0] }
  0x76   :  { %1092 = vmatpush.bf16.msra.mxu2 %v1716_v38  ;;  %v2335_v38 = vld [vmem:[#allocation5 + $0x3d4] sm:$0xf]  ;;  %v2025_v27 = vld [vmem:[#allocation5 + $0x398] sm:$0xf0] }
  0x77   :  { %1106 = vmatpush.bf16.msra.mxu3 %v1780_v45  ;;  %v1996_v45 = vor.u32 %v2319_v36, %v1993_v37  ;;  %v2060_v49 = vor.u32 %v2335_v38, %v2057_v40  ;;  %v2309_v36 = vld [vmem:[#allocation5 + $0x304] sm:$0xf]  ;;  %v1953_v37 = vld [vmem:[#allocation5 + $0x308] sm:$0xf0] }
  0x78   :  { %1065 = vmatpush.bf16.msra.mxu0 %v1580_v52  ;;  %v1985_v52 = vld [vmem:[#allocation5 + $0x348] sm:$0xf0]  ;;  %v2325_v38 = vld [vmem:[#allocation5 + $0x384] sm:$0xf] }
  0x79   :  { %1079 = vmatpush.bf16.msra.mxu1 %v1644_v55  ;;  %v2283_v55 = vld [vmem:[#allocation5 + $0x234] sm:$0xf]  ;;  %v2017_v40 = vld [vmem:[#allocation5 + $0x388] sm:$0xf0] }
  0x7a   :  { %1093 = vmatpush.bf16.msra.mxu2 %v1708_v56  ;;  %v1849_v56 = vld [vmem:[#allocation5 + $0x238] sm:$0xf0] }
  0x7b   :  { %1107 = vmatpush.bf16.msra.mxu3 %v1772_v61  ;;  %v2315_v61 = vld [vmem:[#allocation5 + $0x334] sm:$0xf]  ;;  %v1852_v2 = vor.u32 %v2283_v55, %v1849_v56 }
  0x7c   :  { %1066 = vmatpush.bf16.msra.mxu0 %v1572_v5  ;;  %v1980_v4 = vor.u32 %v2315_v61, %v1977_v62  ;;  %v2281_v5 = vld [vmem:[#allocation5 + $0x224] sm:$0xf] }
  0x7d   :  { %1080 = vmatpush.bf16.msra.mxu1 %v1636_v9  ;;  %v1905_v9 = vld [vmem:[#allocation5 + $0x2a8] sm:$0xf0] }
  0x7e   :  { %1094 = vmatpush.bf16.msra.mxu2 %v1700_v11  ;;  %v2313_v11 = vld [vmem:[#allocation5 + $0x324] sm:$0xf]  ;;  %v1908_v16 = vor.u32 %v2297_v7, %v1905_v9 }
  0x7f   :  { %1108 = vmatpush.bf16.msra.mxu3 %v1764_v14  ;;  %1067 = vmatmul.bf16.vlgmr.msra.gmra.mxu0 %v2662_v58  ;;  %v2049_v58 = vld [vmem:[#allocation5 + $0x3c8] sm:$0xf0]  ;;  %v1972_v18 = vor.u32 %v2313_v11, %v1969_v12 }
  0x80   :  { %1115 = vmatpush.bf16.msrb.mxu0 %v1884_v15  ;;  %1081 = vmatmul.bf16.vlgmr.msra.gmra.mxu1 %v2668_v10  ;;  %v1988_v10 = vor.u32 %v2317_v51, %v1985_v52  ;;  %v2052_v59 = vor.u32 %v2333_v53, %v2049_v58  ;;  %v2033_v14 = vld [vmem:[#allocation5 + $0x3a8] sm:$0xf0]  ;;  %v1844_v15 = vor.u32 %v2281_v5, %v1841_v6  ;;  %v2344_v51 = vld [vmem:[#allocation8 + $0x18] sm:$0xff]  ;;  %v2343_v53 = vld [vmem:[#allocation8 + $0x10] sm:$0xff] }
  0x81   :  { %1129 = vmatpush.bf16.msrb.mxu1 %v1948_v20  ;;  %1095 = vmatmul.bf16.vlgmr.msra.gmra.mxu2 %v2664_v1  ;;  %v2301_v1 = vld [vmem:[#allocation5 + $0x2c4] sm:$0xf]  ;;  %v1833_v20 = vld [vmem:[#allocation5 + $0x218] sm:$0xf0]  ;;  %v2036_v22 = vor.u32 %v2329_v13, %v2033_v14  ;;  %v2694_v58 = vld [vmem:[#allocation7] sm:$0x3] }
  0x82   :  { %1143 = vmatpush.bf16.msrb.mxu2 %v2012_v21  ;;  %1109 = vmatmul.bf16.vlgmr.msra.gmra.mxu3 %v2670_v17  ;;  %v1860_v17 = vor.u32 %v2285_v46, %v1857_v48  ;;  %v1924_v54 = vor.u32 %v2301_v1, %v1921_v50  ;;  %v2295_v21 = vld [vmem:[#allocation5 + $0x294] sm:$0xf]  ;;  %v2020_v46 = vor.u32 %v2325_v38, %v2017_v40  ;;  %v2348_v48 = vld [vmem:[#allocation8 + $0x38] sm:$0xff]  ;;  %v2345_v50 = vld [vmem:[#allocation8 + $0x20] sm:$0xff] }
  0x83   :  { %1157 = vmatpush.bf16.msrb.mxu3 %v2076_v24  ;;  %v2311_v24 = vld [vmem:[#allocation5 + $0x314] sm:$0xf] }
  0x84   :  { %1116 = vmatpush.bf16.msrb.mxu0 %v1876_v28  ;;  %v1836_v28 = vor.u32 %v2279_v19, %v1833_v20  ;;  %v2347_v1 = vld [vmem:[#allocation8 + $0x30] sm:$0xff] }
  0x85   :  { %1130 = vmatpush.bf16.msrb.mxu1 %v1940_v29  ;;  %v1900_v29 = vor.u32 %v2295_v21, %v1897_v23 }
  0x86   :  { %1144 = vmatpush.bf16.msrb.mxu2 %v2004_v30  ;;  %v1964_v30 = vor.u32 %v2311_v24, %v1961_v25 }
  0x87   :  { %1158 = vmatpush.bf16.msrb.mxu3 %v2068_v34  ;;  %v2028_v34 = vor.u32 %v2327_v26, %v2025_v27  ;;  %v2354_v27 = vld [vmem:[#allocation8 + $0x68] sm:$0xff] }
  0x88   :  { %1117 = vmatpush.bf16.msrb.mxu0 %v1868_v41  ;;  %v1828_v41 = vor.u32 %v2277_v31, %v1825_v32  ;;  %v2350_v32 = vld [vmem:[#allocation8 + $0x48] sm:$0xff] }
  0x89   :  { %1131 = vmatpush.bf16.msrb.mxu1 %v1932_v42  ;;  %v1892_v42 = vor.u32 %v2293_v33, %v1889_v35  ;;  %v2349_v35 = vld [vmem:[#allocation8 + $0x40] sm:$0xff] }
  0x8a   :  { %1145 = vmatpush.bf16.msrb.mxu2 %v1996_v45  ;;  %v1956_v45 = vor.u32 %v2309_v36, %v1953_v37 }
  0x8b   :  { %1159 = vmatpush.bf16.msrb.mxu3 %v2060_v49  ;;  %v2346_v49 = vld [vmem:[#allocation8 + $0x28] sm:$0xff] }
  0x8c   :  { %1118 = vmatpush.bf16.msrb.mxu0 %v1860_v17 }
  0x8d   :  { %1132 = vmatpush.bf16.msrb.mxu1 %v1924_v54 }
  0x8e   :  { %1146 = vmatpush.bf16.msrb.mxu2 %v1988_v10  ;;  %v2341_v10 = vld [vmem:[#allocation8] sm:$0xff] }
  0x8f   :  { %1160 = vmatpush.bf16.msrb.mxu3 %v2052_v59 }
  0x90   :  { %1119 = vmatpush.bf16.msrb.mxu0 %v1852_v2 }
  0x91   :  { %1133 = vmatpush.bf16.msrb.mxu1 %v1916_v3 }
  0x92   :  { %1147 = vmatpush.bf16.msrb.mxu2 %v1980_v4 }
  0x93   :  { %1161 = vmatpush.bf16.msrb.mxu3 %v2044_v8 }
  0x94   :  { %1120 = vmatpush.bf16.msrb.mxu0 %v1844_v15 }
  0x95   :  { %1134 = vmatpush.bf16.msrb.mxu1 %v1908_v16 }
  0x96   :  { %1148 = vmatpush.bf16.msrb.mxu2 %v1972_v18  ;;  %v2356_v18 = vld [vmem:[#allocation8 + $0x78] sm:$0xff] }
  0x97   :  { %1162 = vmatpush.bf16.msrb.mxu3 %v2036_v22  ;;  %v2355_v22 = vld [vmem:[#allocation8 + $0x70] sm:$0xff] }
  0x98   :  { %1121 = vmatpush.bf16.msrb.mxu0 %v1836_v28  ;;  %v2353_v28 = vld [vmem:[#allocation8 + $0x60] sm:$0xff] }
  0x99   :  { %1135 = vmatpush.bf16.msrb.mxu1 %v1900_v29  ;;  %v2352_v29 = vld [vmem:[#allocation8 + $0x58] sm:$0xff] }
  0x9a   :  { %1149 = vmatpush.bf16.msrb.mxu2 %v1964_v30  ;;  %v2351_v30 = vld [vmem:[#allocation8 + $0x50] sm:$0xff] }
  0x9b   :  { %1163 = vmatpush.bf16.msrb.mxu3 %v2028_v34  ;;  %v264_v34 = vperm.slane %v2694_v58, 1 }
  0x9c   :  { %1122 = vmatpush.bf16.msrb.mxu0 %v1828_v41 }
  0x9d   :  { %1136 = vmatpush.bf16.msrb.mxu1 %v1892_v42 }
  0x9e   :  { %1150 = vmatpush.bf16.msrb.mxu2 %v1956_v45 }
  0x9f   :  { %1164 = vmatpush.bf16.msrb.mxu3 %v2020_v46  ;;  %1123 = vmatmul.bf16.vlgmr.msrb.gmra.mxu0 %v2674_v39 }
  0xa0   :  { %1137 = vmatmul.bf16.vlgmr.msrb.gmra.mxu1 %v2678_v44  ;;  %1309 = vmatpush.bf16.msra.mxu0 %v2348_v48  ;;  %v2342_v44 = vld [vmem:[#allocation8 + $0x8] sm:$0xff] }
  0xa1   :  { %1151 = vmatmul.bf16.vlgmr.msrb.gmra.mxu2 %v2676_v43  ;;  %v263_v43 = vperm.slane %v2694_v58, 0  ;;  %1323 = vmatpush.bf16.msra.mxu1 %v2356_v18 }
  0xa2   :  { %1165 = vmatmul.bf16.vlgmr.msrb.gmra.mxu3 %v2680_v47 }
  0xa4   :  { %1310 = vmatpush.bf16.msra.mxu0 %v2347_v1 }
  0xa5   :  { %1324 = vmatpush.bf16.msra.mxu1 %v2355_v22 }
  0xa8   :  { %1311 = vmatpush.bf16.msra.mxu0 %v2346_v49 }
  0xa9   :  { %1325 = vmatpush.bf16.msra.mxu1 %v2354_v27 }
  0xac   :  { %1312 = vmatpush.bf16.msra.mxu0 %v2345_v50 }
  0xad   :  { %1326 = vmatpush.bf16.msra.mxu1 %v2353_v28 }
  0xb0   :  { %1313 = vmatpush.bf16.msra.mxu0 %v2344_v51 }
  0xb1   :  { %1327 = vmatpush.bf16.msra.mxu1 %v2352_v29  ;;  %v2368_v29 = vld [vmem:[#allocation11 + $0x18] sm:$0xff] }
  0xb4   :  { %1314 = vmatpush.bf16.msra.mxu0 %v2343_v53 }
  0xb5   :  { %1328 = vmatpush.bf16.msra.mxu1 %v2351_v30  ;;  %v2367_v30 = vld [vmem:[#allocation11 + $0x10] sm:$0xff] }
  0xb8   :  { %1315 = vmatpush.bf16.msra.mxu0 %v2342_v44 }
  0xb9   :  { %1329 = vmatpush.bf16.msra.mxu1 %v2350_v32  ;;  %v2365_v32 = vld [vmem:[#allocation11] sm:$0xff] }
  0xbc   :  { %v956_v52 = vpop.f32.mrf.mxu0  ;;  %1316 = vmatpush.bf16.msra.mxu0 %v2341_v10 }
  0xbd   :  { %v970_v39 = vpop.f32.mrf.mxu1  ;;  %v957_v17 = vadd.f32 %v956_v52, %v263_v43  ;;  %1330 = vmatpush.bf16.msra.mxu1 %v2349_v35 }
  0xbf   :  { %v971_v57 = vadd.f32 %v970_v39, %v957_v17 }
  0xc4   :  { %v984_v47 = vpop.f32.mrf.mxu2  ;;  %v958_v55 = vpop.f32.mrf.mxu0 }
  0xc5   :  { %v998_v54 = vpop.f32.mrf.mxu3  ;;  %v972_v56 = vpop.f32.mrf.mxu1  ;;  %v959_v59 = vadd.f32 %v958_v55, %v263_v43  ;;  %v985_v60 = vadd.f32 %v984_v47, %v971_v57 }
  0xc7   :  { %v973_v62 = vadd.f32 %v972_v56, %v959_v59  ;;  %v999_v0 = vadd.f32 %v998_v54, %v985_v60 }
  0xcc   :  { %v986_v61 = vpop.f32.mrf.mxu2 }
  0xcd   :  { %v1000_v63 = vpop.f32.mrf.mxu3  ;;  %v987_v4 = vadd.f32 %v986_v61, %v973_v62 }
  0xcf   :  { %v1001_v6 = vadd.f32 %v1000_v63, %v987_v4  ;;  %v2363_v4 = vld [vmem:[#allocation10 + $0x30] sm:$0xff] }
  0xdc   :  { %v1012_v2 = vpop.f32.mrf.mxu0 }
  0xdd   :  { %v1026_v3 = vpop.f32.mrf.mxu1  ;;  %v1013_v5 = vadd.f32 %v1012_v2, %v999_v0 }
  0xdf   :  { %v1027_v8 = vadd.f32 %v1026_v3, %v1013_v5  ;;  %v2364_v3 = vld [vmem:[#allocation10 + $0x38] sm:$0xff]  ;;  %v2362_v5 = vld [vmem:[#allocation10 + $0x28] sm:$0xff] }
  0xe0   :  { %1408 = vmatpush.bf16.msra.mxu2 %v2364_v3 }
  0xe4   :  { %v1040_v7 = vpop.f32.mrf.mxu2  ;;  %v1014_v9 = vpop.f32.mrf.mxu0  ;;  %1409 = vmatpush.bf16.msra.mxu2 %v2363_v4 }
  0xe5   :  { %v1054_v11 = vpop.f32.mrf.mxu3  ;;  %v1015_v12 = vadd.f32 %v1014_v9, %v1001_v6  ;;  %v1028_v13 = vpop.f32.mrf.mxu1  ;;  %v1041_v14 = vadd.f32 %v1040_v7, %v1027_v8  ;;  %v2361_v6 = vld [vmem:[#allocation10 + $0x20] sm:$0xff]  ;;  %v2360_v7 = vld [vmem:[#allocation10 + $0x18] sm:$0xff]  ;;  %v2359_v8 = vld [vmem:[#allocation10 + $0x10] sm:$0xff] }
  0xe6   :  { %v2358_v9 = vld [vmem:[#allocation10 + $0x8] sm:$0xff] }
  0xe7   :  { %v1029_v15 = vadd.f32 %v1028_v13, %v1015_v12  ;;  %v1055_v19 = vadd.f32 %v1054_v11, %v1041_v14  ;;  %v2357_v11 = vld [vmem:[#allocation10] sm:$0xff]  ;;  %v2372_v12 = vld [vmem:[#allocation11 + $0x38] sm:$0xff]  ;;  %v2371_v13 = vld [vmem:[#allocation11 + $0x30] sm:$0xff] }
  0xe8   :  { %1410 = vmatpush.bf16.msra.mxu2 %v2362_v5  ;;  %1493 = vmatpush.bf16.msra.mxu3 %v2372_v12  ;;  %v2370_v14 = vld [vmem:[#allocation11 + $0x28] sm:$0xff] }
  0xe9   :  { %v1171_v24 = vmax.f32 %v1055_v19, 0.0  ;;  %v2391_v19 = vld [vmem:[%s2717_s4] ss:$0 sm:$0xff] }
  0xec   :  { %v1042_v16 = vpop.f32.mrf.mxu2  ;;  %1411 = vmatpush.bf16.msra.mxu2 %v2361_v6  ;;  %1494 = vmatpush.bf16.msra.mxu3 %v2371_v13 }
  0xed   :  { %v1043_v20 = vadd.f32 %v1042_v16, %v1029_v15  ;;  %v1056_v21 = vpop.f32.mrf.mxu3  ;;  %v2369_v15 = vld [vmem:[#allocation11 + $0x20] sm:$0xff] }
  0xef   :  { %v1057_v23 = vadd.f32 %v1056_v21, %v1043_v20 }
  0xf0   :  { %1412 = vmatpush.bf16.msra.mxu2 %v2360_v7  ;;  %1495 = vmatpush.bf16.msra.mxu3 %v2370_v14 }
  0xf1   :  { %v1173_v25 = vmax.f32 %v1057_v23, 0.0 }
  0xf3   :  { %v1175_v26 = vpack.c.bf16 %v1173_v25, %v1171_v24 }
  0xf4   :  { %1413 = vmatpush.bf16.msra.mxu2 %v2359_v8  ;;  %1496 = vmatpush.bf16.msra.mxu3 %v2369_v15 }
  0xf5   :  { %1317 = vmatmul.bf16.vlgmr.msra.gmra.mxu0 %v1175_v26 }
  0xf8   :  { %1414 = vmatpush.bf16.msra.mxu2 %v2358_v9  ;;  %1497 = vmatpush.bf16.msra.mxu3 %v2368_v29 }
  0xfc   :  { %v1068_v31 = vpop.f32.mrf.mxu0  ;;  %1415 = vmatpush.bf16.msra.mxu2 %v2357_v11  ;;  %1498 = vmatpush.bf16.msra.mxu3 %v2367_v30 }
  0xfd   :  { %v1082_v33 = vpop.f32.mrf.mxu1  ;;  %v1069_v38 = vadd.f32 %v1068_v31, %v264_v34  ;;  %v2366_v31 = vld [vmem:[#allocation11 + $0x8] sm:$0xff] }
  0xff   :  { %v1083_v42 = vadd.f32 %v1082_v33, %v1069_v38 }
 0x100   :  { %1499 = vmatpush.bf16.msra.mxu3 %v2366_v31 }
 0x104   :  { %v1096_v36 = vpop.f32.mrf.mxu2  ;;  %v1070_v40 = vpop.f32.mrf.mxu0  ;;  %1500 = vmatpush.bf16.msra.mxu3 %v2365_v32 }
 0x105   :  { %v1110_v37 = vpop.f32.mrf.mxu3  ;;  %v1084_v41 = vpop.f32.mrf.mxu1  ;;  %v1071_v45 = vadd.f32 %v1070_v40, %v264_v34  ;;  %v1097_v48 = vadd.f32 %v1096_v36, %v1083_v42  ;;  %v2392_v34 = vld [vmem:[%s2719_s6] ss:$0 sm:$0xff] }
 0x107   :  { %v1085_v1 = vadd.f32 %v1084_v41, %v1071_v45  ;;  %v1111_v52 = vadd.f32 %v1110_v37, %v1097_v48  ;;  %v2393_v45 = vld [vmem:[%s2721_s8] ss:$0 sm:$0xff] }
 0x10c   :  { %v1098_v46 = vpop.f32.mrf.mxu2 }
 0x10d   :  { %v1112_v49 = vpop.f32.mrf.mxu3  ;;  %v1099_v53 = vadd.f32 %v1098_v46, %v1085_v1 }
 0x10f   :  { %v1113_v58 = vadd.f32 %v1112_v49, %v1099_v53 }
 0x11c   :  { %v1124_v50 = vpop.f32.mrf.mxu0 }
 0x11d   :  { %v1138_v51 = vpop.f32.mrf.mxu1  ;;  %v1125_v39 = vadd.f32 %v1124_v50, %v1111_v52 }
 0x11f   :  { %v1139_v17 = vadd.f32 %v1138_v51, %v1125_v39 }
 0x124   :  { %v1152_v43 = vpop.f32.mrf.mxu2  ;;  %v1126_v47 = vpop.f32.mrf.mxu0 }
 0x125   :  { %v1166_v44 = vpop.f32.mrf.mxu3  ;;  %v1127_v54 = vadd.f32 %v1126_v47, %v1113_v58  ;;  %v1153_v10 = vadd.f32 %v1152_v43, %v1139_v17  ;;  %v1140_v55 = vpop.f32.mrf.mxu1 }
 0x127   :  { %v1141_v56 = vadd.f32 %v1140_v55, %v1127_v54  ;;  %v1167_v59 = vadd.f32 %v1166_v44, %v1153_v10 }
 0x129   :  { %v1172_v63 = vmax.f32 %v1167_v59, 0.0 }
 0x12c   :  { %v1154_v57 = vpop.f32.mrf.mxu2 }
 0x12d   :  { %v1155_v60 = vadd.f32 %v1154_v57, %v1141_v56  ;;  %v1168_v61 = vpop.f32.mrf.mxu3 }
 0x12f   :  { %v1169_v62 = vadd.f32 %v1168_v61, %v1155_v60 }
 0x131   :  { %v1174_v0 = vmax.f32 %v1169_v62, 0.0 }
 0x133   :  { %v1176_v2 = vpack.c.bf16 %v1174_v0, %v1172_v63 }
 0x135   :  { %1331 = vmatmul.bf16.vlgmr.msra.gmra.mxu1 %v1176_v2 }
 0x172   :  { %v1318_v16 = vpop.f32.mrf.mxu0 }
 0x173   :  { %v1319_v21 = vadd.f32 %v2391_v19, %v1318_v16 }
 0x17a   :  { %v1320_v20 = vpop.f32.mrf.mxu0 }
 0x17b   :  { %v1321_v22 = vadd.f32 %v2391_v19, %v1320_v20 }
 0x1b2   :  { %v1332_v18 = vpop.f32.mrf.mxu1 }
 0x1b3   :  { %v1333_v23 = vadd.f32 %v1332_v18, %v1319_v21 }
 0x1b5   :  { %v1337_v26 = vmax.f32 %v1333_v23, 0.0 }
 0x1ba   :  { %v1334_v24 = vpop.f32.mrf.mxu1 }
 0x1bb   :  { %v1335_v25 = vadd.f32 %v1334_v24, %v1321_v22 }
 0x1bd   :  { %v1338_v27 = vmax.f32 %v1335_v25, 0.0 }
 0x1bf   :  { %v1339_v28 = vpack.c.bf16 %v1338_v27, %v1337_v26 }
 0x1c1   :  { %1416 = vmatmul.bf16.vlgmr.msra.gmra.mxu2 %v1339_v28 }
 0x244   :  { %v1417_v33 = vpop.f32.mrf.mxu2 }
 0x245   :  { %v1418_v35 = vadd.f32 %v2392_v34, %v1417_v33 }
 0x247   :  { %v1422_v38 = vmax.f32 %v1418_v35, 0.0 }
 0x24c   :  { %v1419_v36 = vpop.f32.mrf.mxu2 }
 0x24d   :  { %v1420_v37 = vadd.f32 %v2392_v34, %v1419_v36 }
 0x24f   :  { %v1423_v40 = vmax.f32 %v1420_v37, 0.0 }
 0x251   :  { %v1424_v41 = vpack.c.bf16 %v1423_v40, %v1422_v38 }
 0x253   :  { %1501 = vmatmul.bf16.vlgmr.msra.gmra.mxu3 %v1424_v41 }
 0x2d6   :  { %v1502_v42 = vpop.f32.mrf.mxu3 }
 0x2d7   :  { %v1503_v48 = vadd.f32 %v2393_v45, %v1502_v42 }
 0x2de   :  { %v1504_v46 = vpop.f32.mrf.mxu3 }
 0x2df   :  { %v1505_v1 = vadd.f32 %v2393_v45, %v1504_v46 }
 0x2e1   :  { %v2376_v49 = vpack.c.bf16 %v1505_v1, %v1503_v48 }
 0x2e3   :  { %2377 = vst [vmem:[#allocation13] sm:$0xff] %v2376_v49  }
 0x2e4   :  { %1523 = dma.vmem_to_hbm [thread:$0]  %s1516_s25, 128, %s1518_s27, [#allocation4], %s2576_s21, %s2576_s21, %s2577_s22  }
 0x2e5   :  { %2570 = dma.done.wait [#allocation4], 128  }
 0x2e6   :  { %2571 = vsyncadd [#allocation4], 4294967168 }
 0x2e7   :  { %1528 = vsyncpa [#allocation3], 1 }
 0x2e8   :  { %1529 = vsyncpa [#allocation6], 1 }
 0x2e9   :  { %1530 = vsyncpa [#allocation9], 1 }
 0x2ea   :  { %1531 = vsyncpa [#allocation12], 1 }
 0x2eb   :  { %1532 = vsyncpa [#allocation4], 1 }

</bundles_post_ra>
